<compile_context>
chip_gen: v6e
topology: v6e:2x2x1
jax: 0.10.0
libtpu: 0.0.40
codegen_flags: <defaults>
</compile_context>

<pallas_src>
import jax
import jax.numpy as jnp
from jax.experimental import pallas as pl
from jax.experimental.pallas import tpu as pltpu


# ----------------------------------------------------------------------------
# Zero-data-movement identity: both refs live in HBM and the output buffer is
# aliased to the input buffer, so there is nothing to load, compute, or store.
# ----------------------------------------------------------------------------
def _noop_alias_kernel(x_hbm_ref, o_hbm_ref):
    # Intentionally empty: output == input buffer via input_output_aliases.
    pass


def _identity_noop(x):
    return pl.pallas_call(
        _noop_alias_kernel,
        out_shape=jax.ShapeDtypeStruct(x.shape, x.dtype),
        in_specs=[pl.BlockSpec(memory_space=pl.ANY)],
        out_specs=pl.BlockSpec(memory_space=pl.ANY),
        input_output_aliases={0: 0},
    )(x)


# ----------------------------------------------------------------------------
# Materialized copy: lane-dense tiled VMEM memcpy (only when a fresh buffer is
# actually wanted).
# ----------------------------------------------------------------------------
_LANE_CANDIDATES = (2048, 1024, 512, 256, 128)


def _identity_copy_kernel(x_ref, o_ref):
    # Straight VMEM copy of the current tile (full-width vld/vst).
    o_ref[...] = x_ref[...]


def _sublane_multiple(dtype):
    # Native sublane tile height: 8 rows for 32-bit, 16 for 16-bit, 32 for 8-bit.
    return max(8, 32 // jnp.dtype(dtype).itemsize)


def _identity_copy(x):
    orig_shape = x.shape
    dtype = x.dtype
    itemsize = jnp.dtype(dtype).itemsize
    total = x.size

    # Lane-dense 2D layout: last dim a large multiple of 128 so every store is
    # an unmasked full-width vst, independent of the original NCHW W.
    lane = next((c for c in _LANE_CANDIDATES if total % c == 0), None)
    if lane is None:
        # Element count not a multiple of 128: a lane-dense copy would need
        # padding / masked stores, and a single full-extent block could blow
        # VMEM. The op is an identity, so just hand x back (review feedback).
        return x

    rows = total // lane
    x2d = x.reshape(rows, lane)

    # Generation-aware tile sizing.
    try:
        vmem_capacity = pltpu.get_tpu_info().vmem_capacity_bytes
    except Exception:
        vmem_capacity = 128 * 1024 * 1024
    if vmem_capacity <= 64 * 1024 * 1024:
        # v7x-class: 3.2 TB/s HBM -> bigger tiles to amortize the ~0.35 us
        # per-grid-step overhead; 6 x 8 MiB buffers stays well under 64 MiB.
        target_tile_bytes = 8 * 1024 * 1024
        vmem_limit_cap = 48 * 1024 * 1024
    else:
        # v5e/v6e-class: 2 MiB tiles already reach ~85% of HBM roofline; keep
        # the scoped-VMEM request modest so compiler scratch is not squeezed.
        target_tile_bytes = 2 * 1024 * 1024
        vmem_limit_cap = 16 * 1024 * 1024

    sub = _sublane_multiple(dtype)
    bytes_per_row = lane * itemsize
    row_block = max(1, target_tile_bytes // bytes_per_row)
    if row_block >= sub:
        row_block = (row_block // sub) * sub  # keep blocks sublane-aligned
    if row_block > rows:
        row_block = rows                      # full-extent block: always legal

    # Megacore: v7x has 2 TensorCores — make sure the "parallel" grid axis has
    # at least 2 programs whenever there is enough work to split.
    if pl.cdiv(rows, row_block) < 2 and rows >= 2 * sub:
        row_block = max(sub, ((rows // 2) // sub) * sub)

    tile_bytes = row_block * lane * itemsize
    vmem_limit = int(min(max(6 * tile_bytes, 4 * 1024 * 1024), vmem_limit_cap))

    out2d = pl.pallas_call(
        _identity_copy_kernel,
        out_shape=jax.ShapeDtypeStruct((rows, lane), dtype),
        grid=(pl.cdiv(rows, row_block),),     # ragged tail handled by Pallas
        in_specs=[pl.BlockSpec((row_block, lane), lambda i: (i, 0))],
        out_specs=pl.BlockSpec((row_block, lane), lambda i: (i, 0)),
        cost_estimate=pl.CostEstimate(
            flops=0, transcendentals=0, bytes_accessed=2 * total * itemsize),
        compiler_params=pltpu.CompilerParams(
            dimension_semantics=("parallel",),
            vmem_limit_bytes=vmem_limit,
        ),
    )(x2d)
    return out2d.reshape(orig_shape)


# ----------------------------------------------------------------------------
# Module forward
# ----------------------------------------------------------------------------
def print_forward(x, *, materialize_copy=False):
    """Equivalent of Print.forward: prints the shape and returns x unchanged.

    Default path: zero-copy aliased no-op kernel.
    materialize_copy=True: produce a fresh buffer via the tiled VMEM copy.
    """
    # Side effect from the original module. Under jit this fires at trace
    # time only (shapes are static); use jax.debug.print for per-execution
    # printing if that semantics were ever required.
    print(x.shape)

    if x.size == 0:
        return x

    if materialize_copy:
        return _identity_copy(x)

    try:
        return _identity_noop(x)
    except Exception:
        # Conservative fallback (eager-mode only): if the aliased no-op path
        # fails to lower on this backend, pay one HBM read+write instead.
        return _identity_copy(x)


if __name__ == "__main__":
    key = jax.random.PRNGKey(0)
    # Small NCHW input consistent with an image-classifier feature map.
    x = jax.random.normal(key, (2, 4, 16, 16), dtype=jnp.float32)

    # Default zero-data-movement path.
    y = jax.block_until_ready(print_forward(x))
    assert y.shape == x.shape and y.dtype == x.dtype
    assert bool(jnp.all(y == x))

    # Materialized-copy path (exercises the tiled VMEM copy kernel too).
    y2 = jax.block_until_ready(print_forward(x, materialize_copy=True))
    assert y2.shape == x.shape and y2.dtype == x.dtype
    assert bool(jnp.all(y2 == x))

    print("KERNEL_OK")
</pallas_src>

<mosaic_0001>
module attributes {stable_mosaic.version = 11 : i64} {
  func.func @_noop_alias_kernel(%arg0: memref<2x4x16x16xf32, #tpu.memory_space<any>>, %arg1: memref<2x4x16x16xf32, #tpu.memory_space<any>>) attributes {dimension_semantics = [], scalar_prefetch = 0 : i64, scratch_operands = 0 : i64, tpu.core_type = #tpu.core_type<tc>} {
    return
  }
}

module attributes {stable_mosaic.version = 11 : i64} {
  func.func @_identity_copy_kernel(%arg0: i32, %arg1: memref<1x2048xf32, #tpu.memory_space<vmem>>, %arg2: memref<1x2048xf32, #tpu.memory_space<vmem>>) attributes {dimension_semantics = [#tpu.dimension_semantics<parallel>], iteration_bounds = array<i64: 1>, scalar_prefetch = 0 : i64, scratch_operands = 0 : i64, tpu.core_type = #tpu.core_type<tc>, window_params = [{transform_indices = @transform_0, window_bounds = array<i64: 1, 2048>}, {transform_indices = @transform_1, window_bounds = array<i64: 1, 2048>}]} {
    %c0 = arith.constant 0 : index
    %c0_0 = arith.constant 0 : index
    %0 = vector.load %arg1[%c0, %c0_0] : memref<1x2048xf32, #tpu.memory_space<vmem>>, vector<1x2048xf32>
    %c0_1 = arith.constant 0 : index
    %c0_2 = arith.constant 0 : index
    %1 = vector.load %arg2[%c0_1, %c0_2] : memref<1x2048xf32, #tpu.memory_space<vmem>>, vector<1x2048xf32>
    tpu.vector_store %arg2[%c0_1, %c0_2], %0 {strides = array<i32>} : memref<1x2048xf32, #tpu.memory_space<vmem>>, vector<1x2048xf32>,
    return
  }
  func.func @transform_0(%arg0: i32) -> (i32, i32) {
    %c0_i32 = arith.constant 0 : i32
    %c0_i32_0 = arith.constant 0 : i32
    return %arg0, %c0_i32 : i32, i32
  }
  func.func @transform_1(%arg0: i32) -> (i32, i32) {
    %c0_i32 = arith.constant 0 : i32
    %c0_i32_0 = arith.constant 0 : i32
    return %arg0, %c0_i32 : i32, i32
  }
}

</mosaic_0001>

<bundles_post_ra>
// kernel: tpu_custom_call.1
= control target key start
LH: loop header
LB: loop body
LE: loop exit
PB: predicated region body
PF: predicated region fallthrough
CT: control target
= control target key end

     0   :  { %s16_s0 = inlined_call_operand.hbm [shape: f32[2,4,16,16], index: 0, kind: input, shape index: {}, may-alias: {0,1}]   ;;  %s17_s1 = inlined_call_operand.hbm [shape: f32[2,4,16,16], index: 1, kind: output, shape index: {}, may-alias: {0,1}]  }

// kernel: tpu_custom_call.1
= control target key start
LH: loop header
LB: loop body
LE: loop exit
PB: predicated region body
PF: predicated region fallthrough
CT: control target
= control target key end

     0   :  { %6 = vsyncpa [#allocation3], 0  ;;  %s104_s0 = inlined_call_operand.hbm [shape: f32[1,2048], index: 0, kind: input, shape index: {}]   ;;  %s105_s1 = inlined_call_operand.hbm [shape: f32[1,2048], index: 1, kind: output, shape index: {}]  }
   0x1   :  { %7 = vsyncpa [#allocation4], 0  ;;  %s86_s6 = smov [#allocation2]  }
   0x2   :  { %s14_s7 = sshll.u32 %s86_s6, 4  ;;  %s15_s7 = int_to_ptr.vmem [resolvable:$true] %s14_s7 }
   0x3   :  { %s50_s8 = scalar_lea.vmem %s15_s7, 256  ;;  %p55_p1 = scmp.lt.s32.totalorder %s15_s7, %s15_s7 }
   0x4   :  { %p51_p0 = scmp.ne.s32.totalorder %s15_s7, %s50_s8  ;;  %p56_p2 = scmp.lt.s32.totalorder %s50_s8, %s50_s8 }
   0x6   :  { %p57_p3 = por %p56_p2, %p55_p1 }
   0x8   :  { %p58_p4 = pnand %p57_p3, %p51_p0 }
   0xa   :  { %61 = shalt.err (!%p58_p4)
}
   0xb   :  { %17 = dma.hbm_to_vmem [thread:$0]  %s104_s0, 256, %s15_s7, [#allocation3]  }
   0xc   :  { %82 = dma.done.wait [#allocation3], 256  }
   0xd   :  { %83 = vsyncadd [#allocation3], 4294967040  ;;  %s87_s11 = smov [#allocation5]   ;;  %v21_v0 = vld [vmem:[#allocation2] sm:$0xff]  ;;  %v22_v1 = vld [vmem:[#allocation2 + $0x8] sm:$0xff] }
   0xe   :  { %s31_s12 = sshll.u32 %s87_s11, 4  ;;  %23 = vst [vmem:[#allocation5] sm:$0xff] %v21_v0  ;;  %24 = vst [vmem:[#allocation5 + $0x8] sm:$0xff] %v22_v1  ;;  %s32_s12 = int_to_ptr.vmem [resolvable:$true] %s31_s12 }
   0xf   :  { %s62_s13 = scalar_lea.vmem %s32_s12, 256  ;;  %p67_p6 = scmp.lt.s32.totalorder %s32_s12, %s32_s12 }
  0x10   :  { %p63_p5 = scmp.ne.s32.totalorder %s32_s12, %s62_s13  ;;  %p68_p7 = scmp.lt.s32.totalorder %s62_s13, %s62_s13 }
  0x12   :  { %p69_p8 = por %p68_p7, %p67_p6 }
  0x14   :  { %p70_p9 = pnand %p69_p8, %p63_p5 }
  0x16   :  { %73 = shalt.err (!%p70_p9)
}
  0x17   :  { %34 = dma.vmem_to_hbm [thread:$0]  %s32_s12, 256, %s105_s1, [#allocation4]  }
  0x18   :  { %84 = dma.done.wait [#allocation4], 256  }
  0x19   :  { %85 = vsyncadd [#allocation4], 4294967040 }
  0x1a   :  { %38 = vsyncpa [#allocation3], 1 }
  0x1b   :  { %39 = vsyncpa [#allocation4], 1 }

</bundles_post_ra>
